<compile_context>
chip_gen: v7x
topology: tpu7x:2x2x1
jax: 0.10.0
libtpu: 0.0.40
codegen_flags: <defaults>
</compile_context>

<pallas_src>
import functools

import jax
import jax.numpy as jnp
from jax.experimental import pallas as pl
from jax.experimental.pallas import tpu as pltpu

_VMEM_LIMIT_CACHE = None


def _vmem_limit():
    """Generation-aware VMEM request (leave headroom on v7x's 64 MiB)."""
    global _VMEM_LIMIT_CACHE
    if _VMEM_LIMIT_CACHE is None:
        try:
            cap = int(pltpu.get_tpu_info().vmem_capacity_bytes)
        except Exception:
            cap = 0
        if cap and cap > 64 * 1024 * 1024:
            _VMEM_LIMIT_CACHE = 100 * 1024 * 1024   # v5e / v6e: 128 MiB physical
        else:
            _VMEM_LIMIT_CACHE = 48 * 1024 * 1024    # v7x (64 MiB) or unknown
    return _VMEM_LIMIT_CACHE


def _pick(dim, target, align):
    """Largest tile <= target that divides dim and is a multiple of align; else full."""
    if dim <= target:
        return dim
    t = (target // align) * align
    while t >= align:
        if dim % t == 0:
            return t
        t -= align
    return dim


def _weight_spec(bk, bn, index_map, n_blocks):
    """Weight BlockSpec; 3-deep buffering when the weight actually streams."""
    if n_blocks >= 2:
        return pl.BlockSpec((bk, bn), index_map, pipeline_mode=pl.Buffered(3))
    return pl.BlockSpec((bk, bn), index_map)


# ----------------------------- Pallas kernels ------------------------------ #

def _linear_kernel(x_ref, w_ref, b_ref, o_ref, acc_ref, *, activation):
    """Tiled matmul: bf16 operands, f32 accumulator; bias + activation epilogue."""
    @pl.when(pl.program_id(2) == 0)
    def _():
        acc_ref[...] = jnp.zeros_like(acc_ref)

    acc_ref[...] += jnp.dot(x_ref[...], w_ref[...],
                            preferred_element_type=jnp.float32)

    @pl.when(pl.program_id(2) == pl.num_programs(2) - 1)
    def _():
        acc = acc_ref[...] + b_ref[...]
        if activation == "gelu":
            # TODO(synk): tanh-approximate GELU; PyTorch default nn.GELU uses erf.
            acc = 0.5 * acc * (1.0 + jnp.tanh(
                0.7978845608028654 * (acc + 0.044715 * acc * acc * acc)))
        elif activation == "tanh":
            acc = jnp.tanh(acc)
        o_ref[...] = acc.astype(o_ref.dtype)


def linear(x, w, b, activation=None, out_dtype=jnp.bfloat16,
           bm=256, bn=1536, bk=1024):
    """x: [M, K] @ w: [K, N] + b, gridded (M, N, K) with f32 accumulation.

    Defaults give full-K tiles for K<=1024 (QKV / attn-out / pooler) and
    1536-wide N tiles for the FFN up-projection.
    """
    M, K = x.shape
    K2, N = w.shape
    assert K == K2
    bm = _pick(M, bm, 16)      # bf16 sublane packing: 16 rows per tile
    bn = _pick(N, bn, 128)
    bk = _pick(K, bk, 128)
    grid = (M // bm, N // bn, K // bk)
    n_w_blocks = (K // bk) * (N // bn)
    return pl.pallas_call(
        functools.partial(_linear_kernel, activation=activation),
        out_shape=jax.ShapeDtypeStruct((M, N), out_dtype),
        grid=grid,
        in_specs=[
            pl.BlockSpec((bm, bk), lambda i, j, k: (i, k)),
            _weight_spec(bk, bn, lambda i, j, k: (k, j), n_w_blocks),
            pl.BlockSpec((1, bn), lambda i, j, k: (0, j)),
        ],
        out_specs=pl.BlockSpec((bm, bn), lambda i, j, k: (i, j)),
        scratch_shapes=[pltpu.VMEM((bm, bn), jnp.float32)],
        compiler_params=pltpu.CompilerParams(
            dimension_semantics=("parallel", "parallel", "arbitrary"),
            vmem_limit_bytes=_vmem_limit()),
    )(x.astype(jnp.bfloat16), w.astype(jnp.bfloat16),
      b.reshape(1, N).astype(jnp.float32))


def _linear_add_ln_kernel(x_ref, w_ref, b_ref, r_ref, g_ref, be_ref,
                          o_ref, acc_ref, *, eps):
    """Matmul with fused bias + residual add + LayerNorm epilogue (full N tile)."""
    @pl.when(pl.program_id(1) == 0)
    def _():
        acc_ref[...] = jnp.zeros_like(acc_ref)

    acc_ref[...] += jnp.dot(x_ref[...], w_ref[...],
                            preferred_element_type=jnp.float32)

    @pl.when(pl.program_id(1) == pl.num_programs(1) - 1)
    def _():
        y = acc_ref[...] + b_ref[...] + r_ref[...].astype(jnp.float32)
        mean = jnp.mean(y, axis=-1, keepdims=True)
        var = jnp.mean(jnp.square(y - mean), axis=-1, keepdims=True)
        inv = jax.lax.rsqrt(var + eps)
        o_ref[...] = ((y - mean) * inv * g_ref[...] + be_ref[...]).astype(o_ref.dtype)


def linear_add_layernorm(x, w, b, residual, gamma, beta, eps=1e-12,
                         out_dtype=jnp.bfloat16, bm=256, bk=1536):
    """x @ w + b + residual, then LayerNorm over the (full, untiled) N axis."""
    M, K = x.shape
    K2, N = w.shape
    assert K == K2 and residual.shape == (M, N)
    bm = _pick(M, bm, 16)
    bk = _pick(K, bk, 128)
    grid = (M // bm, K // bk)
    return pl.pallas_call(
        functools.partial(_linear_add_ln_kernel, eps=eps),
        out_shape=jax.ShapeDtypeStruct((M, N), out_dtype),
        grid=grid,
        in_specs=[
            pl.BlockSpec((bm, bk), lambda i, k: (i, k)),
            _weight_spec(bk, N, lambda i, k: (k, 0), K // bk),
            pl.BlockSpec((1, N), lambda i, k: (0, 0)),
            pl.BlockSpec((bm, N), lambda i, k: (i, 0)),
            pl.BlockSpec((1, N), lambda i, k: (0, 0)),
            pl.BlockSpec((1, N), lambda i, k: (0, 0)),
        ],
        out_specs=pl.BlockSpec((bm, N), lambda i, k: (i, 0)),
        scratch_shapes=[pltpu.VMEM((bm, N), jnp.float32)],
        compiler_params=pltpu.CompilerParams(
            dimension_semantics=("parallel", "arbitrary"),
            vmem_limit_bytes=_vmem_limit()),
    )(x.astype(jnp.bfloat16), w.astype(jnp.bfloat16),
      b.reshape(1, N).astype(jnp.float32),
      residual.astype(jnp.bfloat16),
      gamma.reshape(1, N).astype(jnp.float32),
      beta.reshape(1, N).astype(jnp.float32))


def _layernorm_kernel(x_ref, g_ref, b_ref, o_ref, *, eps):
    x = x_ref[...].astype(jnp.float32)
    mean = jnp.mean(x, axis=-1, keepdims=True)
    var = jnp.mean(jnp.square(x - mean), axis=-1, keepdims=True)
    inv = jax.lax.rsqrt(var + eps)
    o_ref[...] = ((x - mean) * inv * g_ref[...] + b_ref[...]).astype(o_ref.dtype)


def layernorm(x, g, b, eps=1e-12, out_dtype=jnp.bfloat16, bm=512):
    M, H = x.shape
    bm = _pick(M, bm, 8)
    return pl.pallas_call(
        functools.partial(_layernorm_kernel, eps=eps),
        out_shape=jax.ShapeDtypeStruct((M, H), out_dtype),
        grid=(M // bm,),
        in_specs=[pl.BlockSpec((bm, H), lambda i: (i, 0)),
                  pl.BlockSpec((1, H), lambda i: (0, 0)),
                  pl.BlockSpec((1, H), lambda i: (0, 0))],
        out_specs=pl.BlockSpec((bm, H), lambda i: (i, 0)),
        compiler_params=pltpu.CompilerParams(
            dimension_semantics=("parallel",),
            vmem_limit_bytes=_vmem_limit()),
    )(x, g.reshape(1, H).astype(jnp.float32), b.reshape(1, H).astype(jnp.float32))


def _attention_kernel(qkv_ref, m_ref, o_ref, *, scale):
    """Per-(batch, head) attention on a contiguous head-major [3, S, dh] block.

    bf16 operands on the MXU, f32 accumulation/softmax; one bounded working set
    per grid step (heads are a grid axis, not a Python unroll).
    """
    q = qkv_ref[0, 0, 0]                                # [S, dh] bf16
    k = qkv_ref[0, 0, 1]                                # [S, dh] bf16
    v = qkv_ref[0, 0, 2]                                # [S, dh] bf16
    # QK^T: bf16 x bf16 -> f32; scale + additive mask applied to f32 scores.
    s = jax.lax.dot_general(q, k, (((1,), (1,)), ((), ())),
                            preferred_element_type=jnp.float32)
    s = s * scale + m_ref[0]                            # [S, S] + [1, S]
    s = s - jnp.max(s, axis=-1, keepdims=True)
    p = jnp.exp(s)
    p = p * pl.reciprocal(jnp.sum(p, axis=-1, keepdims=True), approx=True)
    # TODO(synk): for S >= 1024, tile the KV axis with online softmax (flash
    # pattern) instead of materializing the full [S, S] score block.
    o_ref[0, 0] = jnp.dot(p.astype(v.dtype), v,
                          preferred_element_type=jnp.float32).astype(o_ref.dtype)


def attention(qkv_heads, add_mask, scale, out_dtype=jnp.bfloat16):
    """qkv_heads: [B, nH, 3, S, dh]; add_mask: [B, 1, S] -> ctx [B, nH, S, dh]."""
    B, nH, three, S, dh = qkv_heads.shape
    assert three == 3
    return pl.pallas_call(
        functools.partial(_attention_kernel, scale=scale),
        out_shape=jax.ShapeDtypeStruct((B, nH, S, dh), out_dtype),
        grid=(B, nH),
        in_specs=[pl.BlockSpec((1, 1, 3, S, dh), lambda b, h: (b, h, 0, 0, 0)),
                  pl.BlockSpec((1, 1, S), lambda b, h: (b, 0, 0))],
        out_specs=pl.BlockSpec((1, 1, S, dh), lambda b, h: (b, h, 0, 0)),
        compiler_params=pltpu.CompilerParams(
            dimension_semantics=("parallel", "parallel"),
            vmem_limit_bytes=_vmem_limit()),
    )(qkv_heads.astype(jnp.bfloat16), add_mask.astype(jnp.float32))


# ------------------------- parameter initialization ------------------------ #

def init_params(key, cfg):
    H, I = cfg["hidden"], cfg["intermediate"]
    C = cfg["num_classes"]
    Cp = ((C + 127) // 128) * 128     # lane-dense padded classifier width
    std = 0.02

    def nrm(k, shape):
        return std * jax.random.normal(k, shape, dtype=jnp.float32)

    keys = iter(jax.random.split(key, 8 + 8 * cfg["layers"]))
    cls_w = nrm(next(keys), (H, C))
    p = {
        "word_emb": nrm(next(keys), (cfg["vocab"], H)),
        "pos_emb": nrm(next(keys), (cfg["max_pos"], H)),
        "type_emb": nrm(next(keys), (2, H)),
        "emb_ln_g": jnp.ones((H,), jnp.float32),
        "emb_ln_b": jnp.zeros((H,), jnp.float32),
        "pool_w": nrm(next(keys), (H, H)),
        "pool_b": jnp.zeros((H,), jnp.float32),
        # padded once here (not per forward call)
        "cls_w_pad": jnp.zeros((H, Cp), jnp.float32).at[:, :C].set(cls_w),
        "cls_b_pad": jnp.zeros((Cp,), jnp.float32),
        "num_classes": C,
        "layers": [],
    }
    for _ in range(cfg["layers"]):
        p["layers"].append({
            # fused QKV projection: [H, 3H] (== concat of the three H x H weights)
            "qkv_w": nrm(next(keys), (H, 3 * H)),
            "qkv_b": jnp.zeros((3 * H,), jnp.float32),
            "o_w": nrm(next(keys), (H, H)), "o_b": jnp.zeros((H,), jnp.float32),
            "ln1_g": jnp.ones((H,), jnp.float32), "ln1_b": jnp.zeros((H,), jnp.float32),
            "i_w": nrm(next(keys), (H, I)), "i_b": jnp.zeros((I,), jnp.float32),
            "f_w": nrm(next(keys), (I, H)), "f_b": jnp.zeros((H,), jnp.float32),
            "ln2_g": jnp.ones((H,), jnp.float32), "ln2_b": jnp.zeros((H,), jnp.float32),
        })
    return p


# ------------------------------ forward pass ------------------------------- #

def bert_classifier_forward(params, input_ids, attention_mask, cfg):
    B, S = input_ids.shape
    H, nH = cfg["hidden"], cfg["heads"]
    dh = H // nH
    M = B * S

    # TODO(synk): embedding gather (table lookup) stays in plain JAX indexing.
    pos = jnp.arange(S)
    emb = (params["word_emb"][input_ids]
           + params["pos_emb"][pos][None, :, :]
           + params["type_emb"][0][None, None, :])
    h = layernorm(emb.reshape(M, H), params["emb_ln_g"], params["emb_ln_b"])

    # Additive mask kept as [B, 1, S] (broadcast to [S, S] inside the kernel);
    # no [B*heads, S, S] tensor is ever materialized in HBM.
    ext = ((1.0 - attention_mask.astype(jnp.float32)) * -10000.0).reshape(B, 1, S)

    scale = 1.0 / (dh ** 0.5)
    for layer in params["layers"]:
        qkv = linear(h, layer["qkv_w"], layer["qkv_b"])              # [M, 3H]
        # head-major layout for the attention kernel: one XLA transpose per layer
        # (bf16 [B,S,3H]) instead of per-head 64-lane slices inside the kernel.
        qkv_heads = qkv.reshape(B, S, 3, nH, dh).transpose(0, 3, 2, 1, 4)
        ctx = attention(qkv_heads, ext, scale)                       # [B, nH, S, dh]
        ctx = ctx.transpose(0, 2, 1, 3).reshape(M, H)
        h = linear_add_layernorm(ctx, layer["o_w"], layer["o_b"],
                                 h, layer["ln1_g"], layer["ln1_b"])
        inter = linear(h, layer["i_w"], layer["i_b"], activation="gelu")
        h = linear_add_layernorm(inter, layer["f_w"], layer["f_b"],
                                 h, layer["ln2_g"], layer["ln2_b"])

    # BERT pooler: tanh(W @ h[:, 0]) then classifier head (lane-dense padded).
    cls_tok = h.reshape(B, S, H)[:, 0, :]
    pooled = linear(cls_tok, params["pool_w"], params["pool_b"], activation="tanh")
    logits = linear(pooled, params["cls_w_pad"], params["cls_b_pad"],
                    out_dtype=jnp.float32)[:, :params["num_classes"]]
    return logits


# ---------------------------------- main ----------------------------------- #

if __name__ == "__main__":
    cfg = dict(vocab=100, hidden=32, heads=2, layers=2, intermediate=64,
               max_pos=16, num_classes=6)
    B, S = 2, 8

    root = jax.random.PRNGKey(0)
    k_params, k_ids = jax.random.split(root)
    params = init_params(k_params, cfg)

    input_ids = jax.random.randint(k_ids, (B, S), 0, cfg["vocab"], dtype=jnp.int32)
    attention_mask = jnp.ones((B, S), dtype=jnp.int32).at[1, 6:].set(0)

    logits = bert_classifier_forward(params, input_ids, attention_mask, cfg)
    logits = jax.block_until_ready(logits)
    assert logits.shape == (B, cfg["num_classes"])
    assert bool(jnp.all(jnp.isfinite(logits)))
    print("KERNEL_OK")
</pallas_src>

<mosaic_0001>
module attributes {stable_mosaic.version = 11 : i64} {
  func.func @_layernorm_kernel(%arg0: i32, %arg1: memref<16x32xf32, #tpu.memory_space<vmem>>, %arg2: memref<1x32xf32, #tpu.memory_space<vmem>>, %arg3: memref<1x32xf32, #tpu.memory_space<vmem>>, %arg4: memref<16x32xbf16, #tpu.memory_space<vmem>>) attributes {dimension_semantics = [#tpu.dimension_semantics<parallel>], iteration_bounds = array<i64: 1>, scalar_prefetch = 0 : i64, scratch_operands = 0 : i64, tpu.core_type = #tpu.core_type<tc>, window_params = [{transform_indices = @transform_0, window_bounds = array<i64: 16, 32>}, {pipeline_mode = #tpu.pipeline_mode<synchronous>, transform_indices = @transform_1, window_bounds = array<i64: 1, 32>}, {pipeline_mode = #tpu.pipeline_mode<synchronous>, transform_indices = @transform_2, window_bounds = array<i64: 1, 32>}, {transform_indices = @transform_3, window_bounds = array<i64: 16, 32>}]} {
    %c0 = arith.constant 0 : index
    %c0_0 = arith.constant 0 : index
    %0 = vector.load %arg1[%c0, %c0_0] : memref<16x32xf32, #tpu.memory_space<vmem>>, vector<16x32xf32>
    %cst = arith.constant dense<0.000000e+00> : vector<16xf32>
    %1 = vector.multi_reduction <add>, %0, %cst [1] : vector<16x32xf32> to vector<16xf32>
    %2 = vector.shape_cast %1 : vector<16xf32> to vector<16x1xf32>
    %cst_1 = arith.constant 3.200000e+01 : f32
    %3 = vector.broadcast %cst_1 : f32 to vector<16x1xf32>
    %4 = arith.divf %2, %3 : vector<16x1xf32>
    %5 = vector.broadcast %4 : vector<16x1xf32> to vector<16x32xf32>
    %6 = arith.subf %0, %5 : vector<16x32xf32>
    %7 = arith.mulf %6, %6 : vector<16x32xf32>
    %cst_2 = arith.constant dense<0.000000e+00> : vector<16xf32>
    %8 = vector.multi_reduction <add>, %7, %cst_2 [1] : vector<16x32xf32> to vector<16xf32>
    %9 = vector.shape_cast %8 : vector<16xf32> to vector<16x1xf32>
    %cst_3 = arith.constant 3.200000e+01 : f32
    %10 = vector.broadcast %cst_3 : f32 to vector<16x1xf32>
    %11 = arith.divf %9, %10 : vector<16x1xf32>
    %cst_4 = arith.constant 9.99999996E-13 : f32
    %12 = vector.broadcast %cst_4 : f32 to vector<16x1xf32>
    %13 = arith.addf %11, %12 : vector<16x1xf32>
    %14 = math.rsqrt %13 : vector<16x1xf32>
    %15 = vector.broadcast %4 : vector<16x1xf32> to vector<16x32xf32>
    %16 = arith.subf %0, %15 : vector<16x32xf32>
    %17 = vector.broadcast %14 : vector<16x1xf32> to vector<16x32xf32>
    %18 = arith.mulf %16, %17 : vector<16x32xf32>
    %c0_5 = arith.constant 0 : index
    %c0_6 = arith.constant 0 : index
    %19 = vector.load %arg2[%c0_5, %c0_6] : memref<1x32xf32, #tpu.memory_space<vmem>>, vector<1x32xf32>
    %20 = vector.broadcast %19 : vector<1x32xf32> to vector<16x32xf32>
    %21 = arith.mulf %18, %20 : vector<16x32xf32>
    %c0_7 = arith.constant 0 : index
    %c0_8 = arith.constant 0 : index
    %22 = vector.load %arg3[%c0_7, %c0_8] : memref<1x32xf32, #tpu.memory_space<vmem>>, vector<1x32xf32>
    %23 = vector.broadcast %22 : vector<1x32xf32> to vector<16x32xf32>
    %24 = arith.addf %21, %23 : vector<16x32xf32>
    %25 = arith.truncf %24 : vector<16x32xf32> to vector<16x32xbf16>
    %c0_9 = arith.constant 0 : index
    %c0_10 = arith.constant 0 : index
    %26 = vector.load %arg4[%c0_9, %c0_10] : memref<16x32xbf16, #tpu.memory_space<vmem>>, vector<16x32xbf16>
    tpu.vector_store %arg4[%c0_9, %c0_10], %25 {strides = array<i32>} : memref<16x32xbf16, #tpu.memory_space<vmem>>, vector<16x32xbf16>,
    return
  }
  func.func @transform_0(%arg0: i32) -> (i32, i32) {
    %c0_i32 = arith.constant 0 : i32
    %c0_i32_0 = arith.constant 0 : i32
    return %arg0, %c0_i32 : i32, i32
  }
  func.func @transform_1(%arg0: i32) -> (i32, i32) {
    %c0_i32 = arith.constant 0 : i32
    %c0_i32_0 = arith.constant 0 : i32
    %c0_i32_1 = arith.constant 0 : i32
    return %c0_i32, %c0_i32_0 : i32, i32
  }
  func.func @transform_2(%arg0: i32) -> (i32, i32) {
    %c0_i32 = arith.constant 0 : i32
    %c0_i32_0 = arith.constant 0 : i32
    %c0_i32_1 = arith.constant 0 : i32
    return %c0_i32, %c0_i32_0 : i32, i32
  }
  func.func @transform_3(%arg0: i32) -> (i32, i32) {
    %c0_i32 = arith.constant 0 : i32
    %c0_i32_0 = arith.constant 0 : i32
    return %arg0, %c0_i32 : i32, i32
  }
}

</mosaic_0001>

<bundles_post_ra>
// kernel: tpu_custom_call.1
= control target key start
LH: loop header
LB: loop body
LE: loop exit
PB: predicated region body
PF: predicated region fallthrough
CT: control target
= control target key end

     0   :  { %8 = vsyncpa [#allocation3], 0  ;;  %s229_s0 = inlined_call_operand.hbm [shape: f32[16,32], index: 0, kind: input, shape index: {}]   ;;  %s230_s1 = inlined_call_operand.vmem [shape: f32[1,32], index: 1, kind: input, shape index: {}]   ;;  %s231_s2 = inlined_call_operand.vmem [shape: f32[1,32], index: 2, kind: input, shape index: {}]   ;;  %s232_s3 = inlined_call_operand.hbm [shape: bf16[16,32], index: 3, kind: output, shape index: {}]  }
   0x1   :  { %9 = vsyncpa [#allocation4], 0  ;;  %s169_s12 = smov [#allocation2]   ;;  %s121_s16 = scalar_lea.hbm %s229_s0, 256 }
   0x2   :  { %s15_s13 = sshll.u32 %s169_s12, 4  ;;  %p122_p0 = scmp.ne.s32.totalorder %s229_s0, %s121_s16  ;;  %s16_s13 = int_to_ptr.vmem [resolvable:$true] %s15_s13 }
   0x3   :  { %p125_p1 = scmp.lt.u32.totalorder %s121_s16, %s229_s0 }
   0x5   :  { %p127_p2 = pnand %p125_p1, %p122_p0 }
   0x7   :  { %130 = shalt.err (!%p127_p2)
}
   0x8   :  { %s131_s21 = scalar_lea.vmem %s16_s13, 256  ;;  %p136_p4 = scmp.lt.s32.totalorder %s16_s13, %s16_s13 }
   0x9   :  { %p132_p3 = scmp.ne.s32.totalorder %s16_s13, %s131_s21  ;;  %p137_p5 = scmp.lt.s32.totalorder %s131_s21, %s131_s21 }
   0xb   :  { %p138_p6 = por %p137_p5, %p136_p4 }
   0xd   :  { %p139_p7 = pnand %p138_p6, %p132_p3 }
   0xf   :  { %142 = shalt.err (!%p139_p7)
}
  0x10   :  { %s170_s22 = smov 128   ;;  %s171_s23 = smov 8  }
  0x11   :  { %21 = dma.hbm_to_vmem [thread:$0]  %s229_s0, 256, %s16_s13, [#allocation3], %s170_s22, %s170_s22, %s171_s23  }
  0x12   :  { %165 = dma.done.wait [#allocation3], 256  }
  0x13   :  { %166 = vsyncadd [#allocation3], 4294967040  ;;  %vm31_vm0 = vcmask 261120   ;;  %v29_v0 = vld [vmem:[#allocation2] sm:$0xff]  ;;  %v30_v1 = vld [vmem:[#allocation2 + $0x8] sm:$0xff]  ;;  %vm85_vm1 = vcmask 257024  }
  0x14   :  { %v32_v2 = vsel %vm31_vm0, %v29_v0, 0.0  ;;  %v35_v3 = vsel %vm31_vm0, %v30_v1, 0.0  ;;  %v105_v21 = vld [vmem:[%s230_s1] ss:$0 sm:$0xff]  ;;  %s172_s29 = smov [#allocation5]  }
  0x15   :  { %33 = vadd.xlane.f32.xlu0 %v32_v2  ;;  %v106_v23 = vld [vmem:[%s231_s2] ss:$0 sm:$0xff]  ;;  %s93_s30 = sshll.u32 %s172_s29, 4  ;;  %s94_s30 = int_to_ptr.vmem [resolvable:$true] %s93_s30 }
  0x16   :  { %s143_s1 = scalar_lea.vmem %s94_s30, 128  ;;  %p148_p9 = scmp.lt.s32.totalorder %s94_s30, %s94_s30 }
  0x17   :  { %p144_p8 = scmp.ne.s32.totalorder %s94_s30, %s143_s1  ;;  %p149_p10 = scmp.lt.s32.totalorder %s143_s1, %s143_s1 }
  0x19   :  { %36 = vadd.xlane.f32.xlu0 %v35_v3  ;;  %p150_p11 = por %p149_p10, %p148_p9 }
  0x1b   :  { %p151_p12 = pnand %p150_p11, %p144_p8 }
  0xa2   :  { %v34_v4 = vpop.xlane.xlu0 %33 }
  0xa3   :  { %v39_v5 = vmul.f32 0.03125, %v34_v4 }
  0xa5   :  { %v41_v6 = vsub.f32 %v29_v0, %v39_v5 }
  0xa6   :  { %v37_v7 = vpop.xlane.xlu0 %36 }
  0xa7   :  { %v40_v8 = vmul.f32 0.03125, %v37_v7  ;;  %v43_v9 = vmul.f32 %v41_v6, %v41_v6 }
  0xa9   :  { %v42_v10 = vsub.f32 %v30_v1, %v40_v8  ;;  %v45_v11 = vsel %vm31_vm0, %v43_v9, 0.0 }
  0xaa   :  { %46 = vadd.xlane.f32.xlu1 %v45_v11 }
  0xab   :  { %v44_v12 = vmul.f32 %v42_v10, %v42_v10 }
  0xad   :  { %v48_v13 = vsel %vm31_vm0, %v44_v12, 0.0 }
  0xae   :  { %49 = vadd.xlane.f32.xlu1 %v48_v13 }
 0x137   :  { %v47_v14 = vpop.xlane.xlu1 %46 }
 0x138   :  { %v51_v15 = vmul.f32 0.03125, %v47_v14 }
 0x13a   :  { %v53_v16 = vadd.f32 1e-12, %v51_v15 }
 0x13b   :  { %v50_v17 = vpop.xlane.xlu1 %49 }
 0x13c   :  { %117 = vrsqrt.f32 %v53_v16  ;;  %v52_v18 = vmul.f32 0.03125, %v50_v17 }
 0x13e   :  { %v54_v19 = vadd.f32 1e-12, %v52_v18 }
 0x140   :  { %119 = vrsqrt.f32 %v54_v19 }
 0x146   :  { %v118_v20 = vpop.eup %117 }
 0x147   :  { %v57_v22 = vmul.f32 %v118_v20, %v41_v6 }
 0x149   :  { %v66_v24 = vmul.f32 %v105_v21, %v57_v22 }
 0x14a   :  { %v120_v25 = vpop.eup %119 }
 0x14b   :  { %v58_v26 = vmul.f32 %v120_v25, %v42_v10  ;;  %v75_v27 = vadd.f32 %v106_v23, %v66_v24 }
 0x14d   :  { %v67_v28 = vmul.f32 %v105_v21, %v58_v26  ;;  %v109_v29 = vpack.c.bf16 %v75_v27, %v75_v27 }
 0x14f   :  { %v76_v30 = vadd.f32 %v106_v23, %v67_v28  ;;  %86 = vst.msk [vmem:[#allocation5] sm:$0xf] %vm85_vm1, %v109_v29 }
 0x151   :  { %v110_v31 = vpack.c.bf16 %v76_v30, %v76_v30 }
 0x153   :  { %87 = vst.msk [vmem:[#allocation5 + $0x4] sm:$0xf] %vm85_vm1, %v110_v31 }
 0x154   :  { %154 = shalt.err (!%p151_p12)
}
 0x155   :  { %s155_s5 = scalar_lea.hbm %s232_s3, 128 }
 0x156   :  { %p156_p13 = scmp.ne.s32.totalorder %s232_s3, %s155_s5  ;;  %p159_p0 = scmp.lt.u32.totalorder %s155_s5, %s232_s3 }
 0x158   :  { %p161_p1 = pnand %p159_p0, %p156_p13 }
 0x15a   :  { %164 = shalt.err (!%p161_p1)
}
 0x15b   :  { %s173_s10 = smov 64   ;;  %s174_s11 = smov 4  }
 0x15c   :  { %99 = dma.vmem_to_hbm [thread:$0]  %s94_s30, 128, %s232_s3, [#allocation4], %s173_s10, %s173_s10, %s174_s11  }
 0x15d   :  { %167 = dma.done.wait [#allocation4], 128  }
 0x15e   :  { %168 = vsyncadd [#allocation4], 4294967168 }
 0x15f   :  { %103 = vsyncpa [#allocation3], 1 }
 0x160   :  { %104 = vsyncpa [#allocation4], 1 }

</bundles_post_ra>
